<compile_context>
chip_gen: v6e
topology: v6e:2x2x1
jax: 0.10.0
libtpu: 0.0.40
codegen_flags: <defaults>
</compile_context>

<pallas_src>
import jax
import jax.numpy as jnp
import numpy as np
from jax.experimental import pallas as pl
from jax.experimental.pallas import tpu as pltpu

DIM = 2
HIDDEN = 10
OUT = 1

LANES = 128
SUBLANES = 8
_MIN_TB = SUBLANES * LANES          # 1024: batch tile quantum -> full (8,128) vregs
_MAX_TB = 128 * _MIN_TB             # 131072: ~1 MiB of x + 0.5 MiB of y per step


def hamiltonian_kernel(x_ref, w1_ref, b1_ref, w2_ref, b2_ref, o_ref):
    """One batch tile, batch-on-lanes layout.

    x_ref : (DIM, TROWS, 128) VMEM f32  -- batch across sublanes x lanes (dense vregs)
    w1_ref: (DIM*HIDDEN,) SMEM f32      -- w1[d, j] stored at index d*HIDDEN + j
    b1_ref: (HIDDEN,) SMEM f32
    w2_ref: (HIDDEN,) SMEM f32
    b2_ref: (1,) SMEM f32
    o_ref : (TROWS, 128) VMEM f32
    """
    x0 = x_ref[0]                       # (TROWS, 128)
    x1 = x_ref[1]
    # Seed the accumulator with the output bias (saves one add per element).
    y = jnp.full_like(x0, b2_ref[0])
    # 2 -> 10 -> 1 MLP as VPU scalar-broadcast FMAs, fully unrolled over the
    # 10 hidden units (the MXU would be wasted on K=2 / K=10 contractions).
    for j in range(HIDDEN):
        h = w1_ref[j] * x0 + w1_ref[HIDDEN + j] * x1 + b1_ref[j]
        y = y + w2_ref[j] * jnp.maximum(h, 0.0)
    o_ref[...] = y.astype(o_ref.dtype)


def _choose_tiling(batch):
    """Returns (trows, grid): rows-of-128-lanes per step, and grid length."""
    n_sub = -(-batch // _MIN_TB)        # number of 1024-element sub-tiles of work
    max_sub = _MAX_TB // _MIN_TB        # sub-tiles per step at the VMEM cap (128)
    n_steps = -(-n_sub // max_sub)
    if n_sub > 1:
        # At least 2 steps, and an even count, so v7x's two TensorCores both
        # receive work and stay balanced; irrelevant (but harmless) on v5e/v6e.
        n_steps = max(n_steps, 2)
        n_steps += n_steps % 2
    sub_per_step = -(-n_sub // n_steps)
    return sub_per_step * SUBLANES, n_steps


def hamiltonian_nn_forward_feature_major(xt, w1, b1, w2, b2):
    """Forward pass on feature-major input xt of shape (DIM, B).

    Producers that can supply (2, B) directly should call this entry point:
    the per-tile reshape below is free (no transpose), so x is only read
    once, by the kernel's own DMA stream.
    """
    B = xt.shape[1]
    trows, grid = _choose_tiling(B)
    tb = trows * LANES
    b_pad = tb * grid

    xt = xt.astype(jnp.float32)
    if b_pad != B:
        xt = jnp.pad(xt, ((0, 0), (0, b_pad - B)))
    xr = xt.reshape(DIM, b_pad // LANES, LANES)    # contiguous reshape, no copy

    smem = pl.BlockSpec(memory_space=pltpu.MemorySpace.SMEM)
    out = pl.pallas_call(
        hamiltonian_kernel,
        out_shape=jax.ShapeDtypeStruct((b_pad // LANES, LANES), jnp.float32),
        grid_spec=pltpu.PrefetchScalarGridSpec(
            num_scalar_prefetch=0,
            grid=(grid,),
            in_specs=[
                pl.BlockSpec((DIM, trows, LANES), lambda i: (0, i, 0)),
                # Tiny 1-D SMEM params; even if the pipeline re-copies them
                # per step the descriptors move only a few words each.
                smem,  # w1 (flattened to (DIM*HIDDEN,))
                smem,  # b1
                smem,  # w2
                smem,  # b2
            ],
            out_specs=pl.BlockSpec((trows, LANES), lambda i: (i, 0)),
        ),
        compiler_params=pltpu.CompilerParams(
            dimension_semantics=("parallel",)),
    )(
        xr,
        w1.astype(jnp.float32).reshape(DIM * HIDDEN),
        b1.astype(jnp.float32),
        w2.astype(jnp.float32),
        b2.astype(jnp.float32),
    )

    return out.reshape(b_pad)[:B].reshape(B, OUT)


def hamiltonian_nn_forward(x, w1, b1, w2, b2):
    """x: (B, DIM) f32. w1: (DIM, HIDDEN), b1: (HIDDEN,), w2: (HIDDEN,), b2: (1,).

    Weights are stored pre-transposed as (in, out), so this computes
    relu(x @ W1 + b1) @ W2 + b2, matching PyTorch's x @ W.T + b semantics.
    """
    # Batch-on-lanes relayout: the (B,2)->(2,B) transpose is the one remaining
    # extra HBM pass (dim is the minor axis of x, so it cannot be a free
    # reshape). Callers that can produce feature-major data should use
    # hamiltonian_nn_forward_feature_major to skip it (biggest win on v5e).
    return hamiltonian_nn_forward_feature_major(
        x.T.astype(jnp.float32), w1, b1, w2, b2)


def init_params(key):
    """Deterministic init mimicking PyTorch Linear default U(-k, k), k=1/sqrt(fan_in)."""
    k1, k2, k3, k4 = jax.random.split(key, 4)
    bound1 = 1.0 / np.sqrt(DIM)
    bound2 = 1.0 / np.sqrt(HIDDEN)
    # Stored as (in, out) — transposed relative to PyTorch's (out, in).
    w1 = jax.random.uniform(k1, (DIM, HIDDEN), jnp.float32, -bound1, bound1)
    b1 = jax.random.uniform(k2, (HIDDEN,), jnp.float32, -bound1, bound1)
    w2 = jax.random.uniform(k3, (HIDDEN,), jnp.float32, -bound2, bound2)
    b2 = jax.random.uniform(k4, (1,), jnp.float32, -bound2, bound2)
    return w1, b1, w2, b2


def reference_forward(x, w1, b1, w2, b2):
    h = jnp.maximum(x @ w1 + b1[None, :], 0.0)
    return h @ w2.reshape(HIDDEN, OUT) + b2[None, :]


if __name__ == "__main__":
    key = jax.random.PRNGKey(0)
    kx1, kx2, kp = jax.random.split(key, 3)
    w1, b1, w2, b2 = init_params(kp)

    # Small case: B not a multiple of 1024 -> padding path, single-step grid.
    B1 = 300
    x_small = jax.random.normal(kx1, (B1, DIM), jnp.float32)
    out1 = jax.block_until_ready(hamiltonian_nn_forward(x_small, w1, b1, w2, b2))
    ref1 = reference_forward(x_small, w1, b1, w2, b2)
    np.testing.assert_allclose(np.asarray(out1), np.asarray(ref1), rtol=1e-5, atol=1e-5)
    assert out1.shape == (B1, OUT)

    # Larger case: multi-step, even-length grid (double-buffered pipeline,
    # both v7x TensorCores busy), tile derived from B to minimize padding.
    B2 = 5000
    x_big = jax.random.normal(kx2, (B2, DIM), jnp.float32)
    out2 = jax.block_until_ready(hamiltonian_nn_forward(x_big, w1, b1, w2, b2))
    ref2 = reference_forward(x_big, w1, b1, w2, b2)
    np.testing.assert_allclose(np.asarray(out2), np.asarray(ref2), rtol=1e-5, atol=1e-5)
    assert out2.shape == (B2, OUT)

    print("KERNEL_OK")
</pallas_src>

<mosaic_0001>
module attributes {stable_mosaic.version = 11 : i64} {
  func.func @hamiltonian_kernel(%arg0: i32, %arg1: memref<2x8x128xf32, #tpu.memory_space<vmem>>, %arg2: memref<20xf32, #tpu.memory_space<smem>>, %arg3: memref<10xf32, #tpu.memory_space<smem>>, %arg4: memref<10xf32, #tpu.memory_space<smem>>, %arg5: memref<1xf32, #tpu.memory_space<smem>>, %arg6: memref<8x128xf32, #tpu.memory_space<vmem>>) attributes {dimension_semantics = [#tpu.dimension_semantics<parallel>], iteration_bounds = array<i64: 1>, scalar_prefetch = 0 : i64, scratch_operands = 0 : i64, tpu.core_type = #tpu.core_type<tc>, window_params = [{transform_indices = @transform_0, window_bounds = array<i64: 2, 8, 128>}, {transform_indices = @transform_1, window_bounds = array<i64: 20>}, {transform_indices = @transform_2, window_bounds = array<i64: 10>}, {transform_indices = @transform_3, window_bounds = array<i64: 10>}, {transform_indices = @transform_4, window_bounds = array<i64: 1>}, {transform_indices = @transform_5, window_bounds = array<i64: 8, 128>}]} {
    %c0 = arith.constant 0 : index
    %c0_0 = arith.constant 0 : index
    %c0_1 = arith.constant 0 : index
    %0 = vector.load %arg1[%c0, %c0_0, %c0_1] : memref<2x8x128xf32, #tpu.memory_space<vmem>>, vector<1x8x128xf32>
    %1 = vector.shape_cast %0 : vector<1x8x128xf32> to vector<8x128xf32>
    %c1 = arith.constant 1 : index
    %c0_2 = arith.constant 0 : index
    %c0_3 = arith.constant 0 : index
    %2 = vector.load %arg1[%c1, %c0_2, %c0_3] : memref<2x8x128xf32, #tpu.memory_space<vmem>>, vector<1x8x128xf32>
    %3 = vector.shape_cast %2 : vector<1x8x128xf32> to vector<8x128xf32>
    %c0_4 = arith.constant 0 : index
    %4 = memref.load %arg5[%c0_4] : memref<1xf32, #tpu.memory_space<smem>>
    %5 = vector.broadcast %4 : f32 to vector<8x128xf32>
    %c0_5 = arith.constant 0 : index
    %6 = memref.load %arg2[%c0_5] : memref<20xf32, #tpu.memory_space<smem>>
    %7 = vector.broadcast %6 : f32 to vector<8x128xf32>
    %8 = arith.mulf %7, %1 : vector<8x128xf32>
    %c10 = arith.constant 10 : index
    %9 = memref.load %arg2[%c10] : memref<20xf32, #tpu.memory_space<smem>>
    %10 = vector.broadcast %9 : f32 to vector<8x128xf32>
    %11 = arith.mulf %10, %3 : vector<8x128xf32>
    %12 = arith.addf %8, %11 : vector<8x128xf32>
    %c0_6 = arith.constant 0 : index
    %13 = memref.load %arg3[%c0_6] : memref<10xf32, #tpu.memory_space<smem>>
    %14 = vector.broadcast %13 : f32 to vector<8x128xf32>
    %15 = arith.addf %12, %14 : vector<8x128xf32>
    %c0_7 = arith.constant 0 : index
    %16 = memref.load %arg4[%c0_7] : memref<10xf32, #tpu.memory_space<smem>>
    %cst = arith.constant 0.000000e+00 : f32
    %17 = vector.broadcast %cst : f32 to vector<8x128xf32>
    %18 = arith.maximumf %15, %17 : vector<8x128xf32>
    %19 = vector.broadcast %16 : f32 to vector<8x128xf32>
    %20 = arith.mulf %19, %18 : vector<8x128xf32>
    %21 = arith.addf %5, %20 : vector<8x128xf32>
    %c1_8 = arith.constant 1 : index
    %22 = memref.load %arg2[%c1_8] : memref<20xf32, #tpu.memory_space<smem>>
    %23 = vector.broadcast %22 : f32 to vector<8x128xf32>
    %24 = arith.mulf %23, %1 : vector<8x128xf32>
    %c11 = arith.constant 11 : index
    %25 = memref.load %arg2[%c11] : memref<20xf32, #tpu.memory_space<smem>>
    %26 = vector.broadcast %25 : f32 to vector<8x128xf32>
    %27 = arith.mulf %26, %3 : vector<8x128xf32>
    %28 = arith.addf %24, %27 : vector<8x128xf32>
    %c1_9 = arith.constant 1 : index
    %29 = memref.load %arg3[%c1_9] : memref<10xf32, #tpu.memory_space<smem>>
    %30 = vector.broadcast %29 : f32 to vector<8x128xf32>
    %31 = arith.addf %28, %30 : vector<8x128xf32>
    %c1_10 = arith.constant 1 : index
    %32 = memref.load %arg4[%c1_10] : memref<10xf32, #tpu.memory_space<smem>>
    %cst_11 = arith.constant 0.000000e+00 : f32
    %33 = vector.broadcast %cst_11 : f32 to vector<8x128xf32>
    %34 = arith.maximumf %31, %33 : vector<8x128xf32>
    %35 = vector.broadcast %32 : f32 to vector<8x128xf32>
    %36 = arith.mulf %35, %34 : vector<8x128xf32>
    %37 = arith.addf %21, %36 : vector<8x128xf32>
    %c2 = arith.constant 2 : index
    %38 = memref.load %arg2[%c2] : memref<20xf32, #tpu.memory_space<smem>>
    %39 = vector.broadcast %38 : f32 to vector<8x128xf32>
    %40 = arith.mulf %39, %1 : vector<8x128xf32>
    %c12 = arith.constant 12 : index
    %41 = memref.load %arg2[%c12] : memref<20xf32, #tpu.memory_space<smem>>
    %42 = vector.broadcast %41 : f32 to vector<8x128xf32>
    %43 = arith.mulf %42, %3 : vector<8x128xf32>
    %44 = arith.addf %40, %43 : vector<8x128xf32>
    %c2_12 = arith.constant 2 : index
    %45 = memref.load %arg3[%c2_12] : memref<10xf32, #tpu.memory_space<smem>>
    %46 = vector.broadcast %45 : f32 to vector<8x128xf32>
    %47 = arith.addf %44, %46 : vector<8x128xf32>
    %c2_13 = arith.constant 2 : index
    %48 = memref.load %arg4[%c2_13] : memref<10xf32, #tpu.memory_space<smem>>
    %cst_14 = arith.constant 0.000000e+00 : f32
    %49 = vector.broadcast %cst_14 : f32 to vector<8x128xf32>
    %50 = arith.maximumf %47, %49 : vector<8x128xf32>
    %51 = vector.broadcast %48 : f32 to vector<8x128xf32>
    %52 = arith.mulf %51, %50 : vector<8x128xf32>
    %53 = arith.addf %37, %52 : vector<8x128xf32>
    %c3 = arith.constant 3 : index
    %54 = memref.load %arg2[%c3] : memref<20xf32, #tpu.memory_space<smem>>
    %55 = vector.broadcast %54 : f32 to vector<8x128xf32>
    %56 = arith.mulf %55, %1 : vector<8x128xf32>
    %c13 = arith.constant 13 : index
    %57 = memref.load %arg2[%c13] : memref<20xf32, #tpu.memory_space<smem>>
    %58 = vector.broadcast %57 : f32 to vector<8x128xf32>
    %59 = arith.mulf %58, %3 : vector<8x128xf32>
    %60 = arith.addf %56, %59 : vector<8x128xf32>
    %c3_15 = arith.constant 3 : index
    %61 = memref.load %arg3[%c3_15] : memref<10xf32, #tpu.memory_space<smem>>
    %62 = vector.broadcast %61 : f32 to vector<8x128xf32>
    %63 = arith.addf %60, %62 : vector<8x128xf32>
    %c3_16 = arith.constant 3 : index
    %64 = memref.load %arg4[%c3_16] : memref<10xf32, #tpu.memory_space<smem>>
    %cst_17 = arith.constant 0.000000e+00 : f32
    %65 = vector.broadcast %cst_17 : f32 to vector<8x128xf32>
    %66 = arith.maximumf %63, %65 : vector<8x128xf32>
    %67 = vector.broadcast %64 : f32 to vector<8x128xf32>
    %68 = arith.mulf %67, %66 : vector<8x128xf32>
    %69 = arith.addf %53, %68 : vector<8x128xf32>
    %c4 = arith.constant 4 : index
    %70 = memref.load %arg2[%c4] : memref<20xf32, #tpu.memory_space<smem>>
    %71 = vector.broadcast %70 : f32 to vector<8x128xf32>
    %72 = arith.mulf %71, %1 : vector<8x128xf32>
    %c14 = arith.constant 14 : index
    %73 = memref.load %arg2[%c14] : memref<20xf32, #tpu.memory_space<smem>>
    %74 = vector.broadcast %73 : f32 to vector<8x128xf32>
    %75 = arith.mulf %74, %3 : vector<8x128xf32>
    %76 = arith.addf %72, %75 : vector<8x128xf32>
    %c4_18 = arith.constant 4 : index
    %77 = memref.load %arg3[%c4_18] : memref<10xf32, #tpu.memory_space<smem>>
    %78 = vector.broadcast %77 : f32 to vector<8x128xf32>
    %79 = arith.addf %76, %78 : vector<8x128xf32>
    %c4_19 = arith.constant 4 : index
    %80 = memref.load %arg4[%c4_19] : memref<10xf32, #tpu.memory_space<smem>>
    %cst_20 = arith.constant 0.000000e+00 : f32
    %81 = vector.broadcast %cst_20 : f32 to vector<8x128xf32>
    %82 = arith.maximumf %79, %81 : vector<8x128xf32>
    %83 = vector.broadcast %80 : f32 to vector<8x128xf32>
    %84 = arith.mulf %83, %82 : vector<8x128xf32>
    %85 = arith.addf %69, %84 : vector<8x128xf32>
    %c5 = arith.constant 5 : index
    %86 = memref.load %arg2[%c5] : memref<20xf32, #tpu.memory_space<smem>>
    %87 = vector.broadcast %86 : f32 to vector<8x128xf32>
    %88 = arith.mulf %87, %1 : vector<8x128xf32>
    %c15 = arith.constant 15 : index
    %89 = memref.load %arg2[%c15] : memref<20xf32, #tpu.memory_space<smem>>
    %90 = vector.broadcast %89 : f32 to vector<8x128xf32>
    %91 = arith.mulf %90, %3 : vector<8x128xf32>
    %92 = arith.addf %88, %91 : vector<8x128xf32>
    %c5_21 = arith.constant 5 : index
    %93 = memref.load %arg3[%c5_21] : memref<10xf32, #tpu.memory_space<smem>>
    %94 = vector.broadcast %93 : f32 to vector<8x128xf32>
    %95 = arith.addf %92, %94 : vector<8x128xf32>
    %c5_22 = arith.constant 5 : index
    %96 = memref.load %arg4[%c5_22] : memref<10xf32, #tpu.memory_space<smem>>
    %cst_23 = arith.constant 0.000000e+00 : f32
    %97 = vector.broadcast %cst_23 : f32 to vector<8x128xf32>
    %98 = arith.maximumf %95, %97 : vector<8x128xf32>
    %99 = vector.broadcast %96 : f32 to vector<8x128xf32>
    %100 = arith.mulf %99, %98 : vector<8x128xf32>
    %101 = arith.addf %85, %100 : vector<8x128xf32>
    %c6 = arith.constant 6 : index
    %102 = memref.load %arg2[%c6] : memref<20xf32, #tpu.memory_space<smem>>
    %103 = vector.broadcast %102 : f32 to vector<8x128xf32>
    %104 = arith.mulf %103, %1 : vector<8x128xf32>
    %c16 = arith.constant 16 : index
    %105 = memref.load %arg2[%c16] : memref<20xf32, #tpu.memory_space<smem>>
    %106 = vector.broadcast %105 : f32 to vector<8x128xf32>
    %107 = arith.mulf %106, %3 : vector<8x128xf32>
    %108 = arith.addf %104, %107 : vector<8x128xf32>
    %c6_24 = arith.constant 6 : index
    %109 = memref.load %arg3[%c6_24] : memref<10xf32, #tpu.memory_space<smem>>
    %110 = vector.broadcast %109 : f32 to vector<8x128xf32>
    %111 = arith.addf %108, %110 : vector<8x128xf32>
    %c6_25 = arith.constant 6 : index
    %112 = memref.load %arg4[%c6_25] : memref<10xf32, #tpu.memory_space<smem>>
    %cst_26 = arith.constant 0.000000e+00 : f32
    %113 = vector.broadcast %cst_26 : f32 to vector<8x128xf32>
    %114 = arith.maximumf %111, %113 : vector<8x128xf32>
    %115 = vector.broadcast %112 : f32 to vector<8x128xf32>
    %116 = arith.mulf %115, %114 : vector<8x128xf32>
    %117 = arith.addf %101, %116 : vector<8x128xf32>
    %c7 = arith.constant 7 : index
    %118 = memref.load %arg2[%c7] : memref<20xf32, #tpu.memory_space<smem>>
    %119 = vector.broadcast %118 : f32 to vector<8x128xf32>
    %120 = arith.mulf %119, %1 : vector<8x128xf32>
    %c17 = arith.constant 17 : index
    %121 = memref.load %arg2[%c17] : memref<20xf32, #tpu.memory_space<smem>>
    %122 = vector.broadcast %121 : f32 to vector<8x128xf32>
    %123 = arith.mulf %122, %3 : vector<8x128xf32>
    %124 = arith.addf %120, %123 : vector<8x128xf32>
    %c7_27 = arith.constant 7 : index
    %125 = memref.load %arg3[%c7_27] : memref<10xf32, #tpu.memory_space<smem>>
    %126 = vector.broadcast %125 : f32 to vector<8x128xf32>
    %127 = arith.addf %124, %126 : vector<8x128xf32>
    %c7_28 = arith.constant 7 : index
    %128 = memref.load %arg4[%c7_28] : memref<10xf32, #tpu.memory_space<smem>>
    %cst_29 = arith.constant 0.000000e+00 : f32
    %129 = vector.broadcast %cst_29 : f32 to vector<8x128xf32>
    %130 = arith.maximumf %127, %129 : vector<8x128xf32>
    %131 = vector.broadcast %128 : f32 to vector<8x128xf32>
    %132 = arith.mulf %131, %130 : vector<8x128xf32>
    %133 = arith.addf %117, %132 : vector<8x128xf32>
    %c8 = arith.constant 8 : index
    %134 = memref.load %arg2[%c8] : memref<20xf32, #tpu.memory_space<smem>>
    %135 = vector.broadcast %134 : f32 to vector<8x128xf32>
    %136 = arith.mulf %135, %1 : vector<8x128xf32>
    %c18 = arith.constant 18 : index
    %137 = memref.load %arg2[%c18] : memref<20xf32, #tpu.memory_space<smem>>
    %138 = vector.broadcast %137 : f32 to vector<8x128xf32>
    %139 = arith.mulf %138, %3 : vector<8x128xf32>
    %140 = arith.addf %136, %139 : vector<8x128xf32>
    %c8_30 = arith.constant 8 : index
    %141 = memref.load %arg3[%c8_30] : memref<10xf32, #tpu.memory_space<smem>>
    %142 = vector.broadcast %141 : f32 to vector<8x128xf32>
    %143 = arith.addf %140, %142 : vector<8x128xf32>
    %c8_31 = arith.constant 8 : index
    %144 = memref.load %arg4[%c8_31] : memref<10xf32, #tpu.memory_space<smem>>
    %cst_32 = arith.constant 0.000000e+00 : f32
    %145 = vector.broadcast %cst_32 : f32 to vector<8x128xf32>
    %146 = arith.maximumf %143, %145 : vector<8x128xf32>
    %147 = vector.broadcast %144 : f32 to vector<8x128xf32>
    %148 = arith.mulf %147, %146 : vector<8x128xf32>
    %149 = arith.addf %133, %148 : vector<8x128xf32>
    %c9 = arith.constant 9 : index
    %150 = memref.load %arg2[%c9] : memref<20xf32, #tpu.memory_space<smem>>
    %151 = vector.broadcast %150 : f32 to vector<8x128xf32>
    %152 = arith.mulf %151, %1 : vector<8x128xf32>
    %c19 = arith.constant 19 : index
    %153 = memref.load %arg2[%c19] : memref<20xf32, #tpu.memory_space<smem>>
    %154 = vector.broadcast %153 : f32 to vector<8x128xf32>
    %155 = arith.mulf %154, %3 : vector<8x128xf32>
    %156 = arith.addf %152, %155 : vector<8x128xf32>
    %c9_33 = arith.constant 9 : index
    %157 = memref.load %arg3[%c9_33] : memref<10xf32, #tpu.memory_space<smem>>
    %158 = vector.broadcast %157 : f32 to vector<8x128xf32>
    %159 = arith.addf %156, %158 : vector<8x128xf32>
    %c9_34 = arith.constant 9 : index
    %160 = memref.load %arg4[%c9_34] : memref<10xf32, #tpu.memory_space<smem>>
    %cst_35 = arith.constant 0.000000e+00 : f32
    %161 = vector.broadcast %cst_35 : f32 to vector<8x128xf32>
    %162 = arith.maximumf %159, %161 : vector<8x128xf32>
    %163 = vector.broadcast %160 : f32 to vector<8x128xf32>
    %164 = arith.mulf %163, %162 : vector<8x128xf32>
    %165 = arith.addf %149, %164 : vector<8x128xf32>
    %c0_36 = arith.constant 0 : index
    %c0_37 = arith.constant 0 : index
    %166 = vector.load %arg6[%c0_36, %c0_37] : memref<8x128xf32, #tpu.memory_space<vmem>>, vector<8x128xf32>
    tpu.vector_store %arg6[%c0_36, %c0_37], %165 {strides = array<i32>} : memref<8x128xf32, #tpu.memory_space<vmem>>, vector<8x128xf32>,
    return
  }
  func.func @transform_0(%arg0: i32) -> (i32, i32, i32) {
    %c0_i32 = arith.constant 0 : i32
    %c0_i32_0 = arith.constant 0 : i32
    %c0_i32_1 = arith.constant 0 : i32
    return %c0_i32, %arg0, %c0_i32_0 : i32, i32, i32
  }
  func.func @transform_1(%arg0: i32) -> i32 {
    %c0_i32 = arith.constant 0 : i32
    %c0_i32_0 = arith.constant 0 : i32
    return %c0_i32 : i32
  }
  func.func @transform_2(%arg0: i32) -> i32 {
    %c0_i32 = arith.constant 0 : i32
    %c0_i32_0 = arith.constant 0 : i32
    return %c0_i32 : i32
  }
  func.func @transform_3(%arg0: i32) -> i32 {
    %c0_i32 = arith.constant 0 : i32
    %c0_i32_0 = arith.constant 0 : i32
    return %c0_i32 : i32
  }
  func.func @transform_4(%arg0: i32) -> i32 {
    %c0_i32 = arith.constant 0 : i32
    %c0_i32_0 = arith.constant 0 : i32
    return %c0_i32 : i32
  }
  func.func @transform_5(%arg0: i32) -> (i32, i32) {
    %c0_i32 = arith.constant 0 : i32
    %c0_i32_0 = arith.constant 0 : i32
    return %arg0, %c0_i32 : i32, i32
  }
}

</mosaic_0001>

<bundles_post_ra>
// kernel: tpu_custom_call.1
= control target key start
LH: loop header
LB: loop body
LE: loop exit
PB: predicated region body
PF: predicated region fallthrough
CT: control target
= control target key end

     0   :  { %11 = vsyncpa [#allocation4], 0  ;;  %s500_s0 = inlined_call_operand.hbm [shape: f32[2,8,128], index: 0, kind: input, shape index: {}]   ;;  %s501_s1 = inlined_call_operand.vmem [shape: f32[20], index: 1, kind: input, shape index: {}]   ;;  %s502_s2 = inlined_call_operand.vmem [shape: f32[10], index: 2, kind: input, shape index: {}]   ;;  %s503_s3 = inlined_call_operand.vmem [shape: f32[10], index: 3, kind: input, shape index: {}]   ;;  %s504_s4 = inlined_call_operand.<no memory space> [shape: f32[1], index: 4, kind: input, shape index: {}]   ;;  %s505_s5 = inlined_call_operand.hbm [shape: f32[8,128], index: 5, kind: output, shape index: {}]  }
   0x1   :  { %12 = vsyncpa [#allocation6], 0 }
   0x2   :  { %13 = vsyncpa [#allocation9], 0  ;;  %s43_s20 = sshll.u32 %s502_s2, 4  ;;  %s44_s20 = int_to_ptr.vmem [resolvable:$true] %s43_s20 }
   0x3   :  { %14 = vsyncpa [#allocation5], 0  ;;  %s289_s21 = scalar_lea.vmem %s44_s20, 16  ;;  %p294_p1 = scmp.lt.s32.totalorder %s44_s20, %s44_s20 }
   0x4   :  { %p290_p0 = scmp.ne.s32.totalorder %s44_s20, %s289_s21  ;;  %p295_p2 = scmp.lt.s32.totalorder %s289_s21, %s289_s21 }
   0x6   :  { %p296_p3 = por %p295_p2, %p294_p1 }
   0x8   :  { %p297_p4 = pnand %p296_p3, %p290_p0 }
   0xa   :  { %300 = shalt.err (!%p297_p4)
}
   0xb   :  { %s373_s22 = smov [#allocation8]   ;;  %s374_s23 = smov [#allocation3]  }
   0xc   :  { %46 = dma.vmem_to_smem %s44_s20, 16, %s373_s22, [#allocation9]  }
   0xd   :  { %s20_s24 = sshll.u32 %s374_s23, 4  ;;  %s21_s24 = int_to_ptr.vmem [resolvable:$true] %s20_s24 }
   0xe   :  { %s309_s25 = scalar_lea.vmem %s21_s24, 256  ;;  %p314_p6 = scmp.lt.s32.totalorder %s21_s24, %s21_s24 }
   0xf   :  { %p310_p5 = scmp.ne.s32.totalorder %s21_s24, %s309_s25  ;;  %p315_p7 = scmp.lt.s32.totalorder %s309_s25, %s309_s25 }
  0x11   :  { %p316_p8 = por %p315_p7, %p314_p6 }
  0x13   :  { %p317_p9 = pnand %p316_p8, %p310_p5 }
  0x15   :  { %320 = shalt.err (!%p317_p9)
}
  0x16   :  { %s375_s2 = smov 128   ;;  %s376_s26 = smov 8  }
  0x17   :  { %26 = dma.hbm_to_vmem [thread:$0]  %s500_s0, 256, %s21_s24, [#allocation4], %s375_s2, %s375_s2, %s376_s26  }
  0x18   :  { %s33_s6 = sshll.u32 %s501_s1, 4  ;;  %s53_s9 = sshll.u32 %s503_s3, 4  ;;  %s34_s6 = int_to_ptr.vmem [resolvable:$true] %s33_s6  ;;  %s54_s9 = int_to_ptr.vmem [resolvable:$true] %s53_s9 }
  0x19   :  { %s321_s10 = scalar_lea.vmem %s34_s6, 16  ;;  %p326_p11 = scmp.lt.s32.totalorder %s34_s6, %s34_s6 }
  0x1a   :  { %p322_p10 = scmp.ne.s32.totalorder %s34_s6, %s321_s10  ;;  %p327_p12 = scmp.lt.s32.totalorder %s321_s10, %s321_s10 }
  0x1c   :  { %p328_p13 = por %p327_p12, %p326_p11 }
  0x1e   :  { %p329_p0 = pnand %p328_p13, %p322_p10 }
  0x20   :  { %332 = shalt.err (!%p329_p0)
}
  0x21   :  { %s377_s11 = smov [#allocation7]   ;;  %s333_s0 = scalar_lea.vmem %s54_s9, 16 }
  0x22   :  { %36 = dma.vmem_to_smem %s34_s6, 16, %s377_s11, [#allocation6]  }
  0x23   :  { %p334_p1 = scmp.ne.s32.totalorder %s54_s9, %s333_s0  ;;  %p338_p2 = scmp.lt.s32.totalorder %s54_s9, %s54_s9 }
  0x24   :  { %p339_p3 = scmp.lt.s32.totalorder %s333_s0, %s333_s0 }
  0x26   :  { %p340_p4 = por %p339_p3, %p338_p2 }
  0x28   :  { %p341_p5 = pnand %p340_p4, %p334_p1 }
  0x2a   :  { %344 = shalt.err (!%p341_p5)
}
  0x2b   :  { %s378_s1 = smov [#allocation10]  }
  0x2c   :  { %56 = dma.vmem_to_smem %s54_s9, 16, %s378_s1, [#allocation9]  }
  0x2d   :  { %365 = dma.done.wait [#allocation4], 256  }
  0x2e   :  { %366 = vsyncadd [#allocation4], 4294967040 }
  0x2f   :  { %367 = dma.done.wait [#allocation6], 16  }
  0x30   :  { %368 = vsyncadd [#allocation6], 4294967280 }
  0x31   :  { %369 = dma.done.wait [#allocation9], 32  }
  0x32   :  { %370 = vsyncadd [#allocation9], 4294967264 }
  0x33   :  { %71 = sfence }
  0x34   :  { %s77_s3 = sld [smem:[#allocation7]]  ;;  %v424_v0 = vld [vmem:[#allocation3] sm:$0xff]  ;;  %v426_v1 = vld [vmem:[#allocation3 + $0x8] sm:$0xff]  ;;  %v76_v18 = vstv %s504_s4 }
  0x35   :  { %s245_s12 = sld [smem:[#allocation7 + $0xa]] }
  0x36   :  { %s84_s13 = sld [smem:[#allocation8]] }
  0x37   :  { %s422_s14 = sld [smem:[#allocation10]] }
  0x38   :  { %s246_s15 = sld [smem:[#allocation7 + $0x1]] }
  0x39   :  { %s247_s16 = sld [smem:[#allocation7 + $0xb]] }
  0x3a   :  { %v78_v2 = vstv %s77_s3  ;;  %s248_s17 = sld [smem:[#allocation8 + $0x1]] }
  0x3b   :  { %v79_v3 = vmul.f32 %v78_v2, %v424_v0  ;;  %v81_v4 = vstv %s245_s12  ;;  %s429_s18 = sld [smem:[#allocation10 + $0x1]] }
  0x3c   :  { %v82_v5 = vmul.f32 %v81_v4, %v426_v1  ;;  %s250_s19 = sld [smem:[#allocation7 + $0x2]]  ;;  %v85_v6 = vstv %s84_s13 }
  0x3d   :  { %s251_s20 = sld [smem:[#allocation7 + $0xc]]  ;;  %v89_v13 = vstv %s422_s14 }
  0x3e   :  { %v83_v7 = vadd.f32 %v82_v5, %v79_v3  ;;  %v93_v8 = vstv %s246_s15  ;;  %s432_s21 = sld [smem:[#allocation8 + $0x2]] }
  0x3f   :  { %v94_v9 = vmul.f32 %v93_v8, %v424_v0  ;;  %v96_v10 = vstv %s247_s16  ;;  %s435_s22 = sld [smem:[#allocation10 + $0x2]] }
  0x40   :  { %v86_v11 = vadd.f32 %v85_v6, %v83_v7  ;;  %v97_v12 = vmul.f32 %v96_v10, %v426_v1  ;;  %s254_s23 = sld [smem:[#allocation7 + $0x3]]  ;;  %v100_v14 = vstv %s248_s17 }
  0x41   :  { %s255_s24 = sld [smem:[#allocation7 + $0xd]]  ;;  %v104_v24 = vstv %s429_s18 }
  0x42   :  { %v88_v15 = vmax.f32 %v86_v11, 0.0  ;;  %v98_v16 = vadd.f32 %v97_v12, %v94_v9  ;;  %v108_v17 = vstv %s250_s19  ;;  %s439_s25 = sld [smem:[#allocation8 + $0x3]] }
  0x43   :  { %v109_v19 = vmul.f32 %v108_v17, %v424_v0  ;;  %v111_v20 = vstv %s251_s20  ;;  %s445_s27 = sld [smem:[#allocation10 + $0x3]] }
  0x44   :  { %v90_v21 = vmul.f32 %v89_v13, %v88_v15  ;;  %v101_v22 = vadd.f32 %v100_v14, %v98_v16  ;;  %v112_v23 = vmul.f32 %v111_v20, %v426_v1  ;;  %s258_s28 = sld [smem:[#allocation7 + $0x4]]  ;;  %v115_v25 = vstv %s432_s21 }
  0x45   :  { %s259_s29 = sld [smem:[#allocation7 + $0xe]]  ;;  %v119_v35 = vstv %s435_s22 }
  0x46   :  { %v91_v26 = vadd.f32 %v90_v21, %v76_v18  ;;  %v103_v27 = vmax.f32 %v101_v22, 0.0  ;;  %v113_v28 = vadd.f32 %v112_v23, %v109_v19  ;;  %v123_v29 = vstv %s254_s23  ;;  %s450_s4 = sld [smem:[#allocation8 + $0x4]]  ;;  %s379_s23 = smov [#allocation11]  }
  0x47   :  { %v124_v30 = vmul.f32 %v123_v29, %v424_v0  ;;  %v126_v31 = vstv %s255_s24  ;;  %s453_s30 = sld [smem:[#allocation10 + $0x4]]  ;;  %s234_s24 = sshll.u32 %s379_s23, 4  ;;  %s235_s24 = int_to_ptr.vmem [resolvable:$true] %s234_s24 }
  0x48   :  { %v105_v32 = vmul.f32 %v104_v24, %v103_v27  ;;  %v116_v33 = vadd.f32 %v115_v25, %v113_v28  ;;  %v127_v34 = vmul.f32 %v126_v31, %v426_v1  ;;  %s262_s6 = sld [smem:[#allocation7 + $0x5]]  ;;  %v130_v36 = vstv %s439_s25  ;;  %s345_s25 = scalar_lea.vmem %s235_s24, 128 }
  0x49   :  { %s263_s7 = sld [smem:[#allocation7 + $0xf]]  ;;  %v134_v46 = vstv %s445_s27  ;;  %p346_p6 = scmp.ne.s32.totalorder %s235_s24, %s345_s25 }
  0x4a   :  { %v106_v37 = vadd.f32 %v105_v32, %v91_v26  ;;  %v118_v38 = vmax.f32 %v116_v33, 0.0  ;;  %v128_v39 = vadd.f32 %v127_v34, %v124_v30  ;;  %v138_v40 = vstv %s258_s28  ;;  %s458_s8 = sld [smem:[#allocation8 + $0x5]]  ;;  %p350_p7 = scmp.lt.s32.totalorder %s235_s24, %s235_s24 }
  0x4b   :  { %v139_v41 = vmul.f32 %v138_v40, %v424_v0  ;;  %v141_v42 = vstv %s259_s29  ;;  %s461_s9 = sld [smem:[#allocation10 + $0x5]]  ;;  %p351_p8 = scmp.lt.s32.totalorder %s345_s25, %s345_s25 }
  0x4c   :  { %v120_v43 = vmul.f32 %v119_v35, %v118_v38  ;;  %v131_v44 = vadd.f32 %v130_v36, %v128_v39  ;;  %v142_v45 = vmul.f32 %v141_v42, %v426_v1  ;;  %s266_s10 = sld [smem:[#allocation7 + $0x6]]  ;;  %v145_v47 = vstv %s450_s4 }
  0x4d   :  { %s267_s11 = sld [smem:[#allocation7 + $0x10]]  ;;  %v149_v57 = vstv %s453_s30  ;;  %p352_p9 = por %p351_p8, %p350_p7 }
  0x4e   :  { %v121_v48 = vadd.f32 %v120_v43, %v106_v37  ;;  %v133_v49 = vmax.f32 %v131_v44, 0.0  ;;  %v143_v50 = vadd.f32 %v142_v45, %v139_v41  ;;  %v153_v51 = vstv %s262_s6  ;;  %s466_s0 = sld [smem:[#allocation8 + $0x6]] }
  0x4f   :  { %v154_v52 = vmul.f32 %v153_v51, %v424_v0  ;;  %v156_v53 = vstv %s263_s7  ;;  %s469_s1 = sld [smem:[#allocation10 + $0x6]]  ;;  %p353_p10 = pnand %p352_p9, %p346_p6 }
  0x50   :  { %v135_v54 = vmul.f32 %v134_v46, %v133_v49  ;;  %v146_v55 = vadd.f32 %v145_v47, %v143_v50  ;;  %v157_v56 = vmul.f32 %v156_v53, %v426_v1  ;;  %s270_s3 = sld [smem:[#allocation7 + $0x7]]  ;;  %v160_v58 = vstv %s458_s8 }
  0x51   :  { %s271_s12 = sld [smem:[#allocation7 + $0x11]]  ;;  %v164_v6 = vstv %s461_s9 }
  0x52   :  { %v136_v59 = vadd.f32 %v135_v54, %v121_v48  ;;  %v148_v60 = vmax.f32 %v146_v55, 0.0  ;;  %v158_v61 = vadd.f32 %v157_v56, %v154_v52  ;;  %v168_v62 = vstv %s266_s10  ;;  %s474_s13 = sld [smem:[#allocation8 + $0x7]] }
  0x53   :  { %v169_v63 = vmul.f32 %v168_v62, %v424_v0  ;;  %v171_v2 = vstv %s267_s11  ;;  %s477_s14 = sld [smem:[#allocation10 + $0x7]] }
  0x54   :  { %v150_v3 = vmul.f32 %v149_v57, %v148_v60  ;;  %v161_v4 = vadd.f32 %v160_v58, %v158_v61  ;;  %v172_v5 = vmul.f32 %v171_v2, %v426_v1  ;;  %s274_s15 = sld [smem:[#allocation7 + $0x8]]  ;;  %v175_v7 = vstv %s466_s0 }
  0x55   :  { %s275_s16 = sld [smem:[#allocation7 + $0x12]]  ;;  %v179_v17 = vstv %s469_s1 }
  0x56   :  { %v151_v8 = vadd.f32 %v150_v3, %v136_v59  ;;  %v163_v9 = vmax.f32 %v161_v4, 0.0  ;;  %v173_v10 = vadd.f32 %v172_v5, %v169_v63  ;;  %v183_v11 = vstv %s270_s3  ;;  %s482_s17 = sld [smem:[#allocation8 + $0x8]] }
  0x57   :  { %v184_v12 = vmul.f32 %v183_v11, %v424_v0  ;;  %v186_v13 = vstv %s271_s12  ;;  %s485_s18 = sld [smem:[#allocation10 + $0x8]] }
  0x58   :  { %v165_v14 = vmul.f32 %v164_v6, %v163_v9  ;;  %v176_v15 = vadd.f32 %v175_v7, %v173_v10  ;;  %v187_v16 = vmul.f32 %v186_v13, %v426_v1  ;;  %s278_s19 = sld [smem:[#allocation7 + $0x9]]  ;;  %v190_v18 = vstv %s474_s13 }
  0x59   :  { %s279_s20 = sld [smem:[#allocation7 + $0x13]]  ;;  %v194_v28 = vstv %s477_s14 }
  0x5a   :  { %v166_v19 = vadd.f32 %v165_v14, %v151_v8  ;;  %v178_v20 = vmax.f32 %v176_v15, 0.0  ;;  %v188_v21 = vadd.f32 %v187_v16, %v184_v12  ;;  %v198_v22 = vstv %s274_s15  ;;  %s280_s21 = sld [smem:[#allocation8 + $0x9]] }
  0x5b   :  { %v199_v23 = vmul.f32 %v198_v22, %v424_v0  ;;  %v201_v24 = vstv %s275_s16  ;;  %s281_s22 = sld [smem:[#allocation10 + $0x9]] }
  0x5c   :  { %v180_v25 = vmul.f32 %v179_v17, %v178_v20  ;;  %v191_v26 = vadd.f32 %v190_v18, %v188_v21  ;;  %v202_v27 = vmul.f32 %v201_v24, %v426_v1  ;;  %v205_v29 = vstv %s482_s17 }
  0x5d   :  { %v209_v39 = vstv %s485_s18 }
  0x5e   :  { %v181_v30 = vadd.f32 %v180_v25, %v166_v19  ;;  %v193_v31 = vmax.f32 %v191_v26, 0.0  ;;  %v203_v32 = vadd.f32 %v202_v27, %v199_v23  ;;  %v213_v33 = vstv %s278_s19 }
  0x5f   :  { %v214_v34 = vmul.f32 %v213_v33, %v424_v0  ;;  %v216_v35 = vstv %s279_s20 }
  0x60   :  { %v195_v36 = vmul.f32 %v194_v28, %v193_v31  ;;  %v206_v37 = vadd.f32 %v205_v29, %v203_v32  ;;  %v217_v38 = vmul.f32 %v216_v35, %v426_v1  ;;  %v220_v40 = vstv %s280_s21 }
  0x61   :  { %v224_v46 = vstv %s281_s22 }
  0x62   :  { %v196_v41 = vadd.f32 %v195_v36, %v181_v30  ;;  %v208_v42 = vmax.f32 %v206_v37, 0.0  ;;  %v218_v43 = vadd.f32 %v217_v38, %v214_v34 }
  0x64   :  { %v210_v44 = vmul.f32 %v209_v39, %v208_v42  ;;  %v221_v45 = vadd.f32 %v220_v40, %v218_v43 }
  0x66   :  { %v211_v47 = vadd.f32 %v210_v44, %v196_v41  ;;  %v223_v48 = vmax.f32 %v221_v45, 0.0 }
  0x68   :  { %v225_v49 = vmul.f32 %v224_v46, %v223_v48 }
  0x6a   :  { %v226_v50 = vadd.f32 %v225_v49, %v211_v47 }
  0x6c   :  { %227 = vst [vmem:[#allocation11] sm:$0xff] %v226_v50 }
  0x6d   :  { %356 = shalt.err (!%p353_p10)
}
  0x6e   :  { %237 = dma.vmem_to_hbm [thread:$0]  %s235_s24, 128, %s505_s5, [#allocation5]  }
  0x6f   :  { %371 = dma.done.wait [#allocation5], 128  }
  0x70   :  { %372 = vsyncadd [#allocation5], 4294967168 }
  0x71   :  { %241 = vsyncpa [#allocation4], 1 }
  0x72   :  { %242 = vsyncpa [#allocation5], 1 }
  0x73   :  { %243 = vsyncpa [#allocation6], 1 }
  0x74   :  { %244 = vsyncpa [#allocation9], 1 }

</bundles_post_ra>
